<compile_context>
chip_gen: v6e
topology: v6e:2x2x1
jax: 0.10.0
libtpu: 0.0.40
codegen_flags: <defaults>
</compile_context>

<pallas_src>
import functools

import jax
import jax.numpy as jnp
from jax.experimental import pallas as pl
from jax.experimental.pallas import tpu as pltpu


def _turn_switch_kernel(sep_id_ref, emb_ref, w1_ref, b1_ref, w2_ref, b2_ref,
                        mask_ref, label_ref,
                        comp_ref, logits_ref, loss_ref,
                        sep_s, pre_s,
                        *, n_turns, leaky_rate, loss_scalar, eps):
    # ---- gather [SEP] rows in-kernel (sep positions live in SMEM) ----------
    # pre[t] (previous turn's [SEP]) is sep[t-1]; pre[0] is zeroed, matching
    # `pre_turn_select_embedded[:, 0, :] = 0.0` in the reference module.
    pre_s[...] = jnp.zeros_like(pre_s)
    for t in range(n_turns):                                   # static unroll, T=6
        row = emb_ref[pl.ds(sep_id_ref[t], 1), :]              # (1, D) dynamic load
        sep_s[pl.ds(t, 1), :] = row
        if t + 1 < n_turns:
            pre_s[pl.ds(t + 1, 1), :] = row

    sep = sep_s[...]                                           # [T, D]
    pre = pre_s[...]                                           # [T, D]
    diff = sep - pre                                           # diff_embed
    point = sep * pre                                          # pointwise_embed
    comp = jnp.concatenate([sep, pre, diff, point], axis=-1)   # [T, 4D]
    comp_ref[...] = comp

    # ---- classifier: Linear(4D->H) -> LeakyReLU -> Linear(H->V) -> Sigmoid --
    h = jnp.dot(comp, w1_ref[...], preferred_element_type=jnp.float32) + b1_ref[...]
    h = jnp.where(h > 0, h, leaky_rate * h)
    z = jnp.dot(h, w2_ref[...], preferred_element_type=jnp.float32) + b2_ref[...]
    p = 1.0 / (1.0 + jnp.exp(-z))                              # sigmoid probs [T, V]
    logits_ref[...] = p

    # ---- masked BCE loss ----------------------------------------------------
    # Module clamps the *probabilities* to [1e-4, 1-1e-4] before BCELoss, then
    # masked_select whole rows where mask > 0 and takes the mean.
    y = label_ref[...]                                         # [T, V]
    pc = jnp.clip(p, eps, 1.0 - eps)
    bce = -(y * jnp.log(pc) + (1.0 - y) * jnp.log(1.0 - pc))   # [T, V]
    row_mask = (mask_ref[...] > 0).astype(jnp.float32)         # [T, 1]
    total = jnp.sum(bce * row_mask)
    count = jnp.sum(row_mask) * float(y.shape[-1])
    # PyTorch path: if no active rows, loss is set to 0.0 (matches module).
    loss = jnp.where(count > 0.0, total / jnp.maximum(count, 1.0), 0.0)
    loss_ref[0] = loss * loss_scalar


def turn_switch_classifier_interact(embedded_text_input, sep_id, mask, label,
                                    params, *, leaky_rate=0.2, loss_scalar=4.0):
    """Forward pass matching TurnSwitchClassifierInteract (B=1, eval mode)."""
    w1, b1, w2, b2 = params
    emb = embedded_text_input[0].astype(jnp.float32)           # [S, D] (module assumes B=1)
    T = sep_id.shape[0]
    D = emb.shape[-1]
    V = w2.shape[1]
    assert w1.shape[0] == 4 * D

    mask2d = mask.astype(jnp.float32).reshape(T, 1)
    label2d = label.astype(jnp.float32)

    kernel = functools.partial(_turn_switch_kernel,
                               n_turns=int(T),
                               leaky_rate=float(leaky_rate),
                               loss_scalar=float(loss_scalar),
                               eps=1e-4)

    vmem_spec = pl.BlockSpec(memory_space=pltpu.VMEM)
    smem_spec = pl.BlockSpec(memory_space=pltpu.SMEM)

    comp, logits, loss = pl.pallas_call(
        kernel,
        in_specs=[
            smem_spec,                 # sep_id     (T,)  int32 in SMEM
            vmem_spec,                 # emb        (S, D)
            vmem_spec,                 # W1         (4D, H)
            vmem_spec,                 # b1         (1, H)
            vmem_spec,                 # W2         (H, V)
            vmem_spec,                 # b2         (1, V)
            vmem_spec,                 # mask       (T, 1)
            vmem_spec,                 # label      (T, V)
        ],
        out_specs=(
            vmem_spec,                 # comprehensive_embed (T, 4D)
            vmem_spec,                 # sigmoid logits      (T, V)
            smem_spec,                 # scaled BCE loss     (1,) scalar in SMEM
        ),
        out_shape=(
            jax.ShapeDtypeStruct((T, 4 * D), jnp.float32),
            jax.ShapeDtypeStruct((T, V), jnp.float32),
            jax.ShapeDtypeStruct((1,), jnp.float32),
        ),
        scratch_shapes=[
            pltpu.VMEM((T, D), jnp.float32),   # gathered sep rows
            pltpu.VMEM((T, D), jnp.float32),   # shifted "previous turn" rows
        ],
    )(sep_id.astype(jnp.int32), emb, w1, b1, w2, b2, mask2d, label2d)

    # diff / pointwise are just lane slices of comp — no extra kernel outputs.
    diff = comp[:, 2 * D:3 * D]
    point = comp[:, 3 * D:4 * D]
    return {
        "comprehensive_sep_embed": comp[None, ...],   # [1, T, 4D]
        "turn_sep_mask": mask,
        "diff_embed": diff[None, ...],                # [1, T, D]
        "pointwise_embed": point[None, ...],          # [1, T, D]
        "logits": logits,                             # squeezed [T, V]
        "loss": loss[0],
    }


def init_params(key, input_dim, hidden_dim, vocab_size):
    """Deterministic Linear init (uniform ±1/sqrt(fan_in)), weights stored [in, out]."""
    k1, k2, k3, k4 = jax.random.split(key, 4)
    fan1 = input_dim * 4
    w1 = jax.random.uniform(k1, (fan1, hidden_dim), jnp.float32,
                            -1.0 / jnp.sqrt(fan1), 1.0 / jnp.sqrt(fan1))
    b1 = jax.random.uniform(k2, (1, hidden_dim), jnp.float32,
                            -1.0 / jnp.sqrt(fan1), 1.0 / jnp.sqrt(fan1))
    w2 = jax.random.uniform(k3, (hidden_dim, vocab_size), jnp.float32,
                            -1.0 / jnp.sqrt(hidden_dim), 1.0 / jnp.sqrt(hidden_dim))
    b2 = jax.random.uniform(k4, (1, vocab_size), jnp.float32,
                            -1.0 / jnp.sqrt(hidden_dim), 1.0 / jnp.sqrt(hidden_dim))
    return w1, b1, w2, b2


if __name__ == "__main__":
    # small shapes consistent with the module
    B, S, D = 1, 64, 32          # batch, sequence length, input_dim
    H = 32                       # hidden_dim
    V = 16                       # switch_label_size (len(vocab))
    T = 6                        # max_turn_len

    key = jax.random.PRNGKey(0)
    k_emb, k_lab, k_par = jax.random.split(key, 3)

    embedded_text_input = jax.random.normal(k_emb, (B, S, D), jnp.float32)
    sep_id = jnp.array([5, 15, 25, 35, 45, 55], dtype=jnp.int32)     # turn separator positions
    # create_mask_t semantics: turns 1..n_active-1 are active
    mask = jnp.array([0.0, 1.0, 1.0, 1.0, 0.0, 0.0], dtype=jnp.float32)
    label = (jax.random.uniform(k_lab, (T, V)) > 0.7).astype(jnp.float32)

    params = init_params(k_par, D, H, V)

    out = turn_switch_classifier_interact(embedded_text_input, sep_id, mask,
                                          label, params,
                                          leaky_rate=0.2, loss_scalar=4.0)
    jax.block_until_ready(out["loss"])
    jax.block_until_ready(out["comprehensive_sep_embed"])
    print("KERNEL_OK")
</pallas_src>

<mosaic_0001>
module attributes {stable_mosaic.version = 11 : i64} {
  func.func @_turn_switch_kernel(%arg0: memref<6xi32, #tpu.memory_space<smem>>, %arg1: memref<64x32xf32, #tpu.memory_space<vmem>>, %arg2: memref<128x32xf32, #tpu.memory_space<vmem>>, %arg3: memref<1x32xf32, #tpu.memory_space<vmem>>, %arg4: memref<32x16xf32, #tpu.memory_space<vmem>>, %arg5: memref<1x16xf32, #tpu.memory_space<vmem>>, %arg6: memref<6x1xf32, #tpu.memory_space<vmem>>, %arg7: memref<6x16xf32, #tpu.memory_space<vmem>>, %arg8: memref<6x128xf32, #tpu.memory_space<vmem>>, %arg9: memref<6x16xf32, #tpu.memory_space<vmem>>, %arg10: memref<1xf32, #tpu.memory_space<smem>>, %arg11: memref<6x32xf32, #tpu.memory_space<vmem>>, %arg12: memref<6x32xf32, #tpu.memory_space<vmem>>) attributes {dimension_semantics = [], scalar_prefetch = 0 : i64, scratch_operands = 2 : i64, tpu.core_type = #tpu.core_type<tc>} {
    %cst = arith.constant 0.000000e+00 : f32
    %0 = vector.broadcast %cst : f32 to vector<6x32xf32>
    %c0 = arith.constant 0 : index
    %c0_0 = arith.constant 0 : index
    %1 = vector.load %arg12[%c0, %c0_0] : memref<6x32xf32, #tpu.memory_space<vmem>>, vector<6x32xf32>
    tpu.vector_store %arg12[%c0, %c0_0], %0 {strides = array<i32>} : memref<6x32xf32, #tpu.memory_space<vmem>>, vector<6x32xf32>,
    %c0_1 = arith.constant 0 : index
    %2 = memref.load %arg0[%c0_1] : memref<6xi32, #tpu.memory_space<smem>>
    %3 = arith.index_cast %2 : i32 to index
    %c0_2 = arith.constant 0 : index
    %4 = vector.load %arg1[%3, %c0_2] : memref<64x32xf32, #tpu.memory_space<vmem>>, vector<1x32xf32>
    %c0_3 = arith.constant 0 : index
    %c0_4 = arith.constant 0 : index
    %5 = vector.load %arg11[%c0_3, %c0_4] : memref<6x32xf32, #tpu.memory_space<vmem>>, vector<1x32xf32>
    tpu.vector_store %arg11[%c0_3, %c0_4], %4 {strides = array<i32>} : memref<6x32xf32, #tpu.memory_space<vmem>>, vector<1x32xf32>,
    %c1 = arith.constant 1 : index
    %c0_5 = arith.constant 0 : index
    %6 = vector.load %arg12[%c1, %c0_5] : memref<6x32xf32, #tpu.memory_space<vmem>>, vector<1x32xf32>
    tpu.vector_store %arg12[%c1, %c0_5], %4 {strides = array<i32>} : memref<6x32xf32, #tpu.memory_space<vmem>>, vector<1x32xf32>,
    %c1_6 = arith.constant 1 : index
    %7 = memref.load %arg0[%c1_6] : memref<6xi32, #tpu.memory_space<smem>>
    %8 = arith.index_cast %7 : i32 to index
    %c0_7 = arith.constant 0 : index
    %9 = vector.load %arg1[%8, %c0_7] : memref<64x32xf32, #tpu.memory_space<vmem>>, vector<1x32xf32>
    %c1_8 = arith.constant 1 : index
    %c0_9 = arith.constant 0 : index
    %10 = vector.load %arg11[%c1_8, %c0_9] : memref<6x32xf32, #tpu.memory_space<vmem>>, vector<1x32xf32>
    tpu.vector_store %arg11[%c1_8, %c0_9], %9 {strides = array<i32>} : memref<6x32xf32, #tpu.memory_space<vmem>>, vector<1x32xf32>,
    %c2 = arith.constant 2 : index
    %c0_10 = arith.constant 0 : index
    %11 = vector.load %arg12[%c2, %c0_10] : memref<6x32xf32, #tpu.memory_space<vmem>>, vector<1x32xf32>
    tpu.vector_store %arg12[%c2, %c0_10], %9 {strides = array<i32>} : memref<6x32xf32, #tpu.memory_space<vmem>>, vector<1x32xf32>,
    %c2_11 = arith.constant 2 : index
    %12 = memref.load %arg0[%c2_11] : memref<6xi32, #tpu.memory_space<smem>>
    %13 = arith.index_cast %12 : i32 to index
    %c0_12 = arith.constant 0 : index
    %14 = vector.load %arg1[%13, %c0_12] : memref<64x32xf32, #tpu.memory_space<vmem>>, vector<1x32xf32>
    %c2_13 = arith.constant 2 : index
    %c0_14 = arith.constant 0 : index
    %15 = vector.load %arg11[%c2_13, %c0_14] : memref<6x32xf32, #tpu.memory_space<vmem>>, vector<1x32xf32>
    tpu.vector_store %arg11[%c2_13, %c0_14], %14 {strides = array<i32>} : memref<6x32xf32, #tpu.memory_space<vmem>>, vector<1x32xf32>,
    %c3 = arith.constant 3 : index
    %c0_15 = arith.constant 0 : index
    %16 = vector.load %arg12[%c3, %c0_15] : memref<6x32xf32, #tpu.memory_space<vmem>>, vector<1x32xf32>
    tpu.vector_store %arg12[%c3, %c0_15], %14 {strides = array<i32>} : memref<6x32xf32, #tpu.memory_space<vmem>>, vector<1x32xf32>,
    %c3_16 = arith.constant 3 : index
    %17 = memref.load %arg0[%c3_16] : memref<6xi32, #tpu.memory_space<smem>>
    %18 = arith.index_cast %17 : i32 to index
    %c0_17 = arith.constant 0 : index
    %19 = vector.load %arg1[%18, %c0_17] : memref<64x32xf32, #tpu.memory_space<vmem>>, vector<1x32xf32>
    %c3_18 = arith.constant 3 : index
    %c0_19 = arith.constant 0 : index
    %20 = vector.load %arg11[%c3_18, %c0_19] : memref<6x32xf32, #tpu.memory_space<vmem>>, vector<1x32xf32>
    tpu.vector_store %arg11[%c3_18, %c0_19], %19 {strides = array<i32>} : memref<6x32xf32, #tpu.memory_space<vmem>>, vector<1x32xf32>,
    %c4 = arith.constant 4 : index
    %c0_20 = arith.constant 0 : index
    %21 = vector.load %arg12[%c4, %c0_20] : memref<6x32xf32, #tpu.memory_space<vmem>>, vector<1x32xf32>
    tpu.vector_store %arg12[%c4, %c0_20], %19 {strides = array<i32>} : memref<6x32xf32, #tpu.memory_space<vmem>>, vector<1x32xf32>,
    %c4_21 = arith.constant 4 : index
    %22 = memref.load %arg0[%c4_21] : memref<6xi32, #tpu.memory_space<smem>>
    %23 = arith.index_cast %22 : i32 to index
    %c0_22 = arith.constant 0 : index
    %24 = vector.load %arg1[%23, %c0_22] : memref<64x32xf32, #tpu.memory_space<vmem>>, vector<1x32xf32>
    %c4_23 = arith.constant 4 : index
    %c0_24 = arith.constant 0 : index
    %25 = vector.load %arg11[%c4_23, %c0_24] : memref<6x32xf32, #tpu.memory_space<vmem>>, vector<1x32xf32>
    tpu.vector_store %arg11[%c4_23, %c0_24], %24 {strides = array<i32>} : memref<6x32xf32, #tpu.memory_space<vmem>>, vector<1x32xf32>,
    %c5 = arith.constant 5 : index
    %c0_25 = arith.constant 0 : index
    %26 = vector.load %arg12[%c5, %c0_25] : memref<6x32xf32, #tpu.memory_space<vmem>>, vector<1x32xf32>
    tpu.vector_store %arg12[%c5, %c0_25], %24 {strides = array<i32>} : memref<6x32xf32, #tpu.memory_space<vmem>>, vector<1x32xf32>,
    %c5_26 = arith.constant 5 : index
    %27 = memref.load %arg0[%c5_26] : memref<6xi32, #tpu.memory_space<smem>>
    %28 = arith.index_cast %27 : i32 to index
    %c0_27 = arith.constant 0 : index
    %29 = vector.load %arg1[%28, %c0_27] : memref<64x32xf32, #tpu.memory_space<vmem>>, vector<1x32xf32>
    %c5_28 = arith.constant 5 : index
    %c0_29 = arith.constant 0 : index
    %30 = vector.load %arg11[%c5_28, %c0_29] : memref<6x32xf32, #tpu.memory_space<vmem>>, vector<1x32xf32>
    tpu.vector_store %arg11[%c5_28, %c0_29], %29 {strides = array<i32>} : memref<6x32xf32, #tpu.memory_space<vmem>>, vector<1x32xf32>,
    %c0_30 = arith.constant 0 : index
    %c0_31 = arith.constant 0 : index
    %31 = vector.load %arg11[%c0_30, %c0_31] : memref<6x32xf32, #tpu.memory_space<vmem>>, vector<6x32xf32>
    %c0_32 = arith.constant 0 : index
    %c0_33 = arith.constant 0 : index
    %32 = vector.load %arg12[%c0_32, %c0_33] : memref<6x32xf32, #tpu.memory_space<vmem>>, vector<6x32xf32>
    %33 = arith.subf %31, %32 : vector<6x32xf32>
    %34 = arith.mulf %31, %32 : vector<6x32xf32>
    %35 = tpu.concatenate %31, %32, %33, %34 in 1 : vector<6x32xf32>, vector<6x32xf32>, vector<6x32xf32>, vector<6x32xf32> -> vector<6x128xf32>
    %c0_34 = arith.constant 0 : index
    %c0_35 = arith.constant 0 : index
    %36 = vector.load %arg8[%c0_34, %c0_35] : memref<6x128xf32, #tpu.memory_space<vmem>>, vector<6x128xf32>
    tpu.vector_store %arg8[%c0_34, %c0_35], %35 {strides = array<i32>} : memref<6x128xf32, #tpu.memory_space<vmem>>, vector<6x128xf32>,
    %c0_36 = arith.constant 0 : index
    %c0_37 = arith.constant 0 : index
    %37 = vector.load %arg2[%c0_36, %c0_37] : memref<128x32xf32, #tpu.memory_space<vmem>>, vector<128x32xf32>
    %cst_38 = arith.constant dense<0.000000e+00> : vector<6x32xf32>
    %38 = tpu.matmul %35, %37, %cst_38 {dimension_numbers = #tpu.dot_dimension_numbers<[1], [0], [0], [1], [0, 0, 1, 1], [], []>} : vector<6x128xf32>, vector<128x32xf32>, vector<6x32xf32> -> vector<6x32xf32>
    %c0_39 = arith.constant 0 : index
    %c0_40 = arith.constant 0 : index
    %39 = vector.load %arg3[%c0_39, %c0_40] : memref<1x32xf32, #tpu.memory_space<vmem>>, vector<1x32xf32>
    %40 = vector.broadcast %39 : vector<1x32xf32> to vector<6x32xf32>
    %41 = arith.addf %38, %40 : vector<6x32xf32>
    %cst_41 = arith.constant 0.000000e+00 : f32
    %42 = vector.broadcast %cst_41 : f32 to vector<6x32xf32>
    %43 = arith.cmpf ogt, %41, %42 : vector<6x32xf32>
    %cst_42 = arith.constant 2.000000e-01 : f32
    %44 = vector.broadcast %cst_42 : f32 to vector<6x32xf32>
    %45 = arith.mulf %44, %41 : vector<6x32xf32>
    %46 = arith.select %43, %41, %45 : vector<6x32xi1>, vector<6x32xf32>
    %c0_43 = arith.constant 0 : index
    %c0_44 = arith.constant 0 : index
    %47 = vector.load %arg4[%c0_43, %c0_44] : memref<32x16xf32, #tpu.memory_space<vmem>>, vector<32x16xf32>
    %cst_45 = arith.constant dense<0.000000e+00> : vector<6x16xf32>
    %48 = tpu.matmul %46, %47, %cst_45 {dimension_numbers = #tpu.dot_dimension_numbers<[1], [0], [0], [1], [0, 0, 1, 1], [], []>} : vector<6x32xf32>, vector<32x16xf32>, vector<6x16xf32> -> vector<6x16xf32>
    %c0_46 = arith.constant 0 : index
    %c0_47 = arith.constant 0 : index
    %49 = vector.load %arg5[%c0_46, %c0_47] : memref<1x16xf32, #tpu.memory_space<vmem>>, vector<1x16xf32>
    %50 = vector.broadcast %49 : vector<1x16xf32> to vector<6x16xf32>
    %51 = arith.addf %48, %50 : vector<6x16xf32>
    %cst_48 = arith.constant 0.000000e+00 : f32
    %52 = vector.broadcast %cst_48 : f32 to vector<6x16xf32>
    %53 = arith.subf %52, %51 : vector<6x16xf32>
    %54 = math.exp %53 : vector<6x16xf32>
    %cst_49 = arith.constant 1.000000e+00 : f32
    %55 = vector.broadcast %cst_49 : f32 to vector<6x16xf32>
    %56 = arith.addf %55, %54 : vector<6x16xf32>
    %cst_50 = arith.constant 1.000000e+00 : f32
    %57 = vector.broadcast %cst_50 : f32 to vector<6x16xf32>
    %58 = arith.divf %57, %56 : vector<6x16xf32>
    %c0_51 = arith.constant 0 : index
    %c0_52 = arith.constant 0 : index
    %59 = vector.load %arg9[%c0_51, %c0_52] : memref<6x16xf32, #tpu.memory_space<vmem>>, vector<6x16xf32>
    tpu.vector_store %arg9[%c0_51, %c0_52], %58 {strides = array<i32>} : memref<6x16xf32, #tpu.memory_space<vmem>>, vector<6x16xf32>,
    %c0_53 = arith.constant 0 : index
    %c0_54 = arith.constant 0 : index
    %60 = vector.load %arg7[%c0_53, %c0_54] : memref<6x16xf32, #tpu.memory_space<vmem>>, vector<6x16xf32>
    %cst_55 = arith.constant 9.99999974E-5 : f32
    %cst_56 = arith.constant 0.999899983 : f32
    %61 = vector.broadcast %cst_55 : f32 to vector<6x16xf32>
    %62 = arith.maximumf %61, %58 : vector<6x16xf32>
    %63 = vector.broadcast %cst_56 : f32 to vector<6x16xf32>
    %64 = arith.minimumf %63, %62 : vector<6x16xf32>
    %65 = math.log %64 : vector<6x16xf32>
    %66 = arith.mulf %60, %65 : vector<6x16xf32>
    %cst_57 = arith.constant 1.000000e+00 : f32
    %67 = vector.broadcast %cst_57 : f32 to vector<6x16xf32>
    %68 = arith.subf %67, %60 : vector<6x16xf32>
    %cst_58 = arith.constant 1.000000e+00 : f32
    %69 = vector.broadcast %cst_58 : f32 to vector<6x16xf32>
    %70 = arith.subf %69, %64 : vector<6x16xf32>
    %71 = math.log %70 : vector<6x16xf32>
    %72 = arith.mulf %68, %71 : vector<6x16xf32>
    %73 = arith.addf %66, %72 : vector<6x16xf32>
    %cst_59 = arith.constant 0.000000e+00 : f32
    %74 = vector.broadcast %cst_59 : f32 to vector<6x16xf32>
    %75 = arith.subf %74, %73 : vector<6x16xf32>
    %c0_60 = arith.constant 0 : index
    %c0_61 = arith.constant 0 : index
    %76 = vector.load %arg6[%c0_60, %c0_61] : memref<6x1xf32, #tpu.memory_space<vmem>>, vector<6x1xf32>
    %cst_62 = arith.constant 0.000000e+00 : f32
    %77 = vector.broadcast %cst_62 : f32 to vector<6x1xf32>
    %78 = arith.cmpf ogt, %76, %77 : vector<6x1xf32>
    %79 = arith.extui %78 : vector<6x1xi1> to vector<6x1xi32>
    %80 = arith.sitofp %79 : vector<6x1xi32> to vector<6x1xf32>
    %81 = vector.broadcast %80 : vector<6x1xf32> to vector<6x16xf32>
    %82 = arith.mulf %75, %81 : vector<6x16xf32>
    %83 = vector.shape_cast %82 : vector<6x16xf32> to vector<1x6x16xf32>
    %cst_63 = arith.constant dense<0.000000e+00> : vector<1xf32>
    %84 = vector.multi_reduction <add>, %83, %cst_63 [1, 2] : vector<1x6x16xf32> to vector<1xf32>
    %85 = vector.shape_cast %84 : vector<1xf32> to vector<1x1x1xf32>
    %86 = vector.extract %85[0, 0, 0] : f32 from vector<1x1x1xf32>
    %87 = vector.shape_cast %80 : vector<6x1xf32> to vector<1x6x1xf32>
    %cst_64 = arith.constant dense<0.000000e+00> : vector<1xf32>
    %88 = vector.multi_reduction <add>, %87, %cst_64 [1, 2] : vector<1x6x1xf32> to vector<1xf32>
    %89 = vector.shape_cast %88 : vector<1xf32> to vector<1x1x1xf32>
    %90 = vector.extract %89[0, 0, 0] : f32 from vector<1x1x1xf32>
    %cst_65 = arith.constant 1.600000e+01 : f32
    %91 = arith.mulf %90, %cst_65 : f32
    %cst_66 = arith.constant 0.000000e+00 : f32
    %92 = arith.cmpf ogt, %91, %cst_66 : f32
    %cst_67 = arith.constant 1.000000e+00 : f32
    %93 = arith.maximumf %91, %cst_67 : f32
    %94 = arith.divf %86, %93 : f32
    %cst_68 = arith.constant 0.000000e+00 : f32
    %95 = arith.select %92, %94, %cst_68 : f32
    %cst_69 = arith.constant 4.000000e+00 : f32
    %96 = arith.mulf %95, %cst_69 : f32
    %c0_70 = arith.constant 0 : index
    %97 = memref.load %arg10[%c0_70] : memref<1xf32, #tpu.memory_space<smem>>
    memref.store %96, %arg10[%c0_70] : memref<1xf32, #tpu.memory_space<smem>>
    return
  }
}

</mosaic_0001>

<bundles_post_ra>
// kernel: tpu_custom_call.1
= control target key start
LH: loop header
LB: loop body
LE: loop exit
PB: predicated region body
PF: predicated region fallthrough
CT: control target
= control target key end

     0   :  { %16 = vsyncpa [#allocation7], 0  ;;  %s781_s0 = inlined_call_operand.vmem [shape: s32[6], index: 0, kind: input, shape index: {}]   ;;  %s782_s1 = inlined_call_operand.vmem [shape: f32[64,32], index: 1, kind: input, shape index: {}]   ;;  %s783_s2 = inlined_call_operand.vmem [shape: f32[128,32], index: 2, kind: input, shape index: {}]   ;;  %s784_s3 = inlined_call_operand.vmem [shape: f32[1,32], index: 3, kind: input, shape index: {}]   ;;  %s785_s4 = inlined_call_operand.vmem [shape: f32[32,16], index: 4, kind: input, shape index: {}]   ;;  %s786_s5 = inlined_call_operand.vmem [shape: f32[1,16], index: 5, kind: input, shape index: {}]   ;;  %s787_s6 = inlined_call_operand.vmem [shape: f32[6,1], index: 6, kind: input, shape index: {}]   ;;  %s788_s7 = inlined_call_operand.vmem [shape: f32[6,16], index: 7, kind: input, shape index: {}]   ;;  %s789_s8 = inlined_call_operand.hbm [shape: f32[6,128], index: 8, kind: output, shape index: {0}]   ;;  %s790_s9 = inlined_call_operand.hbm [shape: f32[6,16], index: 9, kind: output, shape index: {1}]   ;;  %s791_s10 = inlined_call_operand.hbm [shape: f32[1], index: 10, kind: output, shape index: {2}]  }
   0x1   :  { %17 = vsyncpa [#allocation5], 0 }
   0x2   :  { %18 = vsyncpa [#allocation10], 0 }
   0x3   :  { %19 = vsyncpa [#allocation6], 0  ;;  %s26_s15 = sshll.u32 %s781_s0, 4  ;;  %s27_s15 = int_to_ptr.vmem [resolvable:$true] %s26_s15 }
   0x4   :  { %s500_s16 = scalar_lea.vmem %s27_s15, 16  ;;  %p505_p1 = scmp.lt.s32.totalorder %s27_s15, %s27_s15 }
   0x5   :  { %p501_p0 = scmp.ne.s32.totalorder %s27_s15, %s500_s16  ;;  %p506_p2 = scmp.lt.s32.totalorder %s500_s16, %s500_s16 }
   0x7   :  { %p507_p3 = por %p506_p2, %p505_p1 }
   0x9   :  { %p508_p4 = pnand %p507_p3, %p501_p0 }
   0xb   :  { %511 = shalt.err (!%p508_p4)
}
   0xc   :  { %s568_s17 = smov [#allocation4]  }
   0xd   :  { %29 = dma.vmem_to_smem %s27_s15, 16, %s568_s17, [#allocation7]  }
   0xe   :  { %560 = dma.done.wait [#allocation7], 16  }
   0xf   :  { %561 = vsyncadd [#allocation7], 4294967280 }
  0x10   :  { %47 = sfence }
  0x11   :  { %vm48_vm0 = vcmask 259072   ;;  %s50_s18 = sld [smem:[#allocation4]]  ;;  %v569_v0 = vmov 0.0   ;;  %v118_v1 = vld [vmem:[%s783_s2 + $0x78] sm:$0xff]  ;;  %v117_v2 = vld [vmem:[%s783_s2 + $0x70] sm:$0xff]  ;;  %v116_v3 = vld [vmem:[%s783_s2 + $0x68] sm:$0xff] }
  0x12   :  { %49 = vst.msk [vmem:[#allocation3] sm:$0x3f] %vm48_vm0, %v569_v0  ;;  %s394_s19 = sld [smem:[#allocation4 + $0x1]]  ;;  %425 = vmatprep.subr.mxu0 %v569_v0  ;;  %460 = vmatprep.subr.mxu1 %v569_v0  ;;  %vm53_vm1 = vcmask 253952   ;;  %v115_v4 = vld [vmem:[%s783_s2 + $0x60] sm:$0xff]  ;;  %v114_v6 = vld [vmem:[%s783_s2 + $0x58] sm:$0xff] }
  0x13   :  { %s395_s23 = sld [smem:[#allocation4 + $0x2]]  ;;  %426 = vmatpush3.msra.mxu0 %v118_v1  ;;  %v113_v9 = vld [vmem:[%s783_s2 + $0x50] sm:$0xff]  ;;  %v112_v12 = vld [vmem:[%s783_s2 + $0x48] sm:$0xff]  ;;  %vm570_vm2 = vmmov 0   ;;  %v111_v14 = vld [vmem:[%s783_s2 + $0x40] sm:$0xff]  ;;  %s571_s22 = smov 32  }
  0x14   :  { %s396_s24 = sld [smem:[#allocation4 + $0x3]]  ;;  %427 = vmatprep.subr.mxu0 %v569_v0  ;;  %457 = vmatprep.mubr.msk.f32.mxu0 %vm570_vm2, %v569_v0  ;;  %v202_v15 = vld [vmem:[%s785_s4 + $0x18] sm:$0xff]  ;;  %v109_v17 = vld [vmem:[%s783_s2 + $0x30] sm:$0xff]  ;;  %v108_v19 = vld [vmem:[%s783_s2 + $0x28] sm:$0xff]  ;;  %s572_s29 = smov 96   ;;  %vm96_vm3 = vcmask 261120  }
  0x15   :  { %s650_s27 = sld [smem:[#allocation4 + $0x4]]  ;;  %428 = vmatpush3.msra.mxu0 %v117_v2  ;;  %468 = vmatprep.mubr.msk.f32.mxu1 %vm570_vm2, %v569_v0  ;;  %v110_v16 = vld [vmem:[%s783_s2 + $0x38] sm:$0xff]  ;;  %v107_v23 = vld [vmem:[%s783_s2 + $0x20] sm:$0xff]  ;;  %v105_v25 = vld [vmem:[%s783_s2 + $0x10] sm:$0xff]  ;;  %vm98_vm4 = vcmask 523264   ;;  %vm100_vm5 = vcmask 785408  }
  0x16   :  { %s652_s28 = sld [smem:[#allocation4 + $0x5]]  ;;  %429 = vmatprep.subr.mxu0 %v569_v0  ;;  %461 = vmatpush3.msra.mxu1 %v202_v15  ;;  %v106_v24 = vld [vmem:[%s783_s2 + $0x18] sm:$0xff]  ;;  %v104_v26 = vld [vmem:[%s783_s2 + $0x8] sm:$0xff]  ;;  %v103_v27 = vld [vmem:[%s783_s2] sm:$0xff]  ;;  %v574_v38 = vmov 0   ;;  %vm324_vm8 = vcmask 5120  }
  0x17   :  { %s51_s13 = scalar_lea.vmem %s782_s1, %s50_s18  ;;  %430 = vmatpush3.msra.mxu0 %v116_v3  ;;  %462 = vmatprep.subr.mxu1 %v569_v0  ;;  %v201_v34 = vld [vmem:[%s785_s4 + $0x10] sm:$0xff]  ;;  %v200_v35 = vld [vmem:[%s785_s4 + $0x8] sm:$0xff]  ;;  %v199_v36 = vld [vmem:[%s785_s4] sm:$0xff]  ;;  %vm289_vm9 = vcmask 128000  }
  0x18   :  { %v52_v5 = vld [vmem:[%s51_s13] sm:$0x1]  ;;  %s57_s16 = scalar_lea.vmem %s782_s1, %s394_s19  ;;  %431 = vmatprep.subr.mxu0 %v569_v0  ;;  %463 = vmatpush3.msra.mxu1 %v201_v34 }
  0x19   :  { %54 = vst.msk [vmem:[#allocation2] sm:$0x1] %vm53_vm1, %v52_v5  ;;  %55 = vst.msk [vmem:[#allocation3 + $0x1] sm:$0x1] %vm53_vm1, %v52_v5  ;;  %v58_v7 = vld [vmem:[%s57_s16] sm:$0x1]  ;;  %s62_s21 = scalar_lea.vmem %s782_s1, %s395_s23  ;;  %432 = vmatpush3.msra.mxu0 %v115_v4  ;;  %464 = vmatprep.subr.mxu1 %v569_v0 }
  0x1a   :  { %59 = vst.msk [vmem:[#allocation2 + $0x1] sm:$0x1] %vm53_vm1, %v58_v7  ;;  %60 = vst.msk [vmem:[#allocation3 + $0x2] sm:$0x1] %vm53_vm1, %v58_v7  ;;  %v63_v8 = vld [vmem:[%s62_s21] sm:$0x1]  ;;  %s67_s25 = scalar_lea.vmem %s782_s1, %s396_s24  ;;  %433 = vmatprep.subr.mxu0 %v569_v0  ;;  %465 = vmatpush3.msra.mxu1 %v200_v35 }
  0x1b   :  { %64 = vst.msk [vmem:[#allocation2 + $0x2] sm:$0x1] %vm53_vm1, %v63_v8  ;;  %65 = vst.msk [vmem:[#allocation3 + $0x3] sm:$0x1] %vm53_vm1, %v63_v8  ;;  %v68_v10 = vld [vmem:[%s67_s25] sm:$0x1]  ;;  %s72_s11 = scalar_lea.vmem %s782_s1, %s650_s27  ;;  %434 = vmatpush3.msra.mxu0 %v114_v6  ;;  %466 = vmatprep.subr.mxu1 %v569_v0 }
  0x1c   :  { %69 = vst.msk [vmem:[#allocation2 + $0x3] sm:$0x1] %vm53_vm1, %v68_v10  ;;  %70 = vst.msk [vmem:[#allocation3 + $0x4] sm:$0x1] %vm53_vm1, %v68_v10  ;;  %v73_v11 = vld [vmem:[%s72_s11] sm:$0x1]  ;;  %s77_s13 = scalar_lea.vmem %s782_s1, %s652_s28  ;;  %435 = vmatprep.subr.mxu0 %v569_v0  ;;  %467 = vmatpush3.msra.mxu1 %v199_v36 }
  0x1d   :  { %74 = vst.msk [vmem:[#allocation2 + $0x4] sm:$0x1] %vm53_vm1, %v73_v11  ;;  %75 = vst.msk [vmem:[#allocation3 + $0x5] sm:$0x1] %vm53_vm1, %v73_v11  ;;  %v78_v13 = vld [vmem:[%s77_s13] sm:$0x1]  ;;  %436 = vmatpush3.msra.mxu0 %v113_v9  ;;  %488 = vset.pattern.permute.xlu1 %v574_v38 }
  0x1e   :  { %79 = vst.msk [vmem:[#allocation2 + $0x5] sm:$0x1] %vm53_vm1, %v78_v13  ;;  %437 = vmatprep.subr.mxu0 %v569_v0  ;;  %s573_s11 = smov 64   ;;  %v304_v37 = vld [vmem:[%s787_s6] sm:$0x3f]  ;;  %489 = vset.pattern.permute.xlu0 %v574_v38  ;;  %s576_s25 = smov [#allocation9]  }
  0x1f   :  { %438 = vmatpush3.msra.mxu0 %v112_v12  ;;  %vm305_vm6 = vcmp.gt.f32.partialorder %v304_v37, 0.0  ;;  %v399_v40 = vld [vmem:[%s784_s3] ss:$0 sm:$0xff]  ;;  %s362_s26 = sshll.u32 %s576_s25, 4  ;;  %s363_s26 = int_to_ptr.vmem [resolvable:$true] %s362_s26 }
  0x20   :  { %439 = vmatprep.subr.mxu0 %v569_v0  ;;  %v402_v39 = vsel %vm305_vm6, 1.0, %v569_v0  ;;  %v400_v47 = vld [vmem:[%s786_s5] ss:$0 sm:$0xff] }
  0x21   :  { %440 = vmatpush3.msra.mxu0 %v111_v14  ;;  %v325_v46 = vsel %vm324_vm8, %v402_v39, 0.0  ;;  %v291_v59 = vld [vmem:[%s788_s7] sm:$0x3f]  ;;  %s575_s7 = smov [#allocation8]  }
  0x22   :  { %441 = vmatprep.subr.mxu0 %v569_v0  ;;  %v297_v61 = vsub.f32 1.0, %v291_v59 }
  0x23   :  { %442 = vmatpush3.msra.mxu0 %v110_v16 }
  0x24   :  { %v81_v18 = vld [vmem:[#allocation3] sm:$0x3f]  ;;  %443 = vmatprep.subr.mxu0 %v569_v0 }
  0x25   :  { %85 = vrot.lane.b32.xlu0 %v81_v18, %s571_s22  ;;  %v80_v20 = vld [vmem:[#allocation2] sm:$0x3f]  ;;  %444 = vmatpush3.msra.mxu0 %v109_v17  ;;  %s352_s22 = sshll.u32 %s575_s7, 4  ;;  %s353_s22 = int_to_ptr.vmem [resolvable:$true] %s352_s22 }
  0x26   :  { %v82_v21 = vsub.f32 %v80_v20, %v81_v18  ;;  %v83_v22 = vmul.f32 %v81_v18, %v80_v20  ;;  %445 = vmatprep.subr.mxu0 %v569_v0  ;;  %p517_p6 = scmp.lt.s32.totalorder %s353_s22, %s353_s22 }
  0x27   :  { %446 = vmatpush3.msra.mxu0 %v108_v19 }
  0x28   :  { %93 = vrot.lane.b32.xlu1 %v83_v22, %s572_s29  ;;  %447 = vmatprep.subr.mxu0 %v569_v0  ;;  %s512_s29 = scalar_lea.vmem %s353_s22, 128 }
  0x29   :  { %89 = vrot.lane.b32.xlu0 %v82_v21, %s573_s11  ;;  %448 = vmatpush3.msra.mxu0 %v107_v23  ;;  %p513_p5 = scmp.ne.s32.totalorder %s353_s22, %s512_s29  ;;  %p518_p7 = scmp.lt.s32.totalorder %s512_s29, %s512_s29 }
  0x2a   :  { %449 = vmatprep.subr.mxu0 %v569_v0 }
  0x2b   :  { %450 = vmatpush3.msra.mxu0 %v106_v24  ;;  %p519_p8 = por %p518_p7, %p517_p6 }
  0x2c   :  { %451 = vmatprep.subr.mxu0 %v569_v0  ;;  %310 = vperm.xlu1 %488, %v402_v39  }
  0x2d   :  { %452 = vmatpush3.msra.mxu0 %v105_v25  ;;  %p520_p9 = pnand %p519_p8, %p513_p5 }
  0x2e   :  { %453 = vmatprep.subr.mxu0 %v569_v0 }
  0x2f   :  { %454 = vmatpush3.msra.mxu0 %v104_v26 }
  0x30   :  { %455 = vmatprep.subr.mxu0 %v569_v0 }
  0x31   :  { %456 = vmatpush3.msra.mxu0 %v103_v27 }
  0x50   :  { %326 = vadd.xlane.f32.xlu1 %v325_v46 }
  0x97   :  { %v86_v28 = vpop.permute.xlu0 %85 }
  0x98   :  { %v97_v30 = vsel %vm96_vm3, %v80_v20, %v86_v28 }
  0x9a   :  { %v94_v29 = vpop.permute.xlu1 %93 }
  0x9b   :  { %v90_v31 = vpop.permute.xlu0 %89 }
  0x9c   :  { %v99_v32 = vsel %vm98_vm4, %v97_v30, %v90_v31 }
  0x9d   :  { %v101_v33 = vsel %vm100_vm5, %v99_v32, %v94_v29 }
  0x9e   :  { %458 = vmatmul.mubr.f32.vlgmr.msra.gmra.mxu0 %v101_v33  ;;  %102 = vst [vmem:[#allocation8] sm:$0x3f] %v101_v33 }
  0xa7   :  { %v311_v4 = vpop.permute.xlu1 %310 }
  0xd9   :  { %v327_v8 = vpop.xlane.xlu1 %326 }
  0xda   :  { %v328_v9 = vrot.slane %v327_v8, 4 }
  0xdc   :  { %v329_v10 = vadd.f32 %v328_v9, %v327_v8 }
  0xde   :  { %v330_v11 = vrot.slane %v329_v10, 2 }
  0xe0   :  { %v331_v15 = vadd.f32 %v330_v11, %v329_v10 }
 0x15e   :  { %v192_v41 = vpop.f32.mrf.mxu0 }
 0x15f   :  { %v193_v42 = vadd.f32 %v399_v40, %v192_v41 }
 0x160   :  { %v459_v43 = vpop.f32.mrf.mxu0 }
 0x161   :  { %vm196_vm7 = vcmp.gt.f32.partialorder %v193_v42, 0.0  ;;  %v197_v44 = vmul.f32 0.2, %v193_v42 }
 0x163   :  { %v198_v45 = vsel %vm196_vm7, %v193_v42, %v197_v44 }
 0x164   :  { %469 = vmatmul.mubr.msk.f32.vlgmr.msra.gmra.mxu1 %vm96_vm3, %v198_v45 }
 0x224   :  { %v279_v48 = vpop.f32.mrf.mxu1 }
 0x225   :  { %v280_v49 = vadd.f32 %v400_v47, %v279_v48 }
 0x226   :  { %v470_v50 = vpop.f32.mrf.mxu1 }
 0x227   :  { %v283_v51 = vsub.f32 0.0, %v280_v49 }
 0x229   :  { %v284_v52 = vmul.f32 1.442695, %v283_v51 }
 0x22b   :  { %490 = vpow2.f32 %v284_v52 }
 0x238   :  { %v491_v53 = vpop.eup %490 }
 0x239   :  { %v286_v54 = vadd.f32 1.0, %v491_v53 }
 0x23b   :  { %492 = vrcp.f32 %v286_v54 }
 0x248   :  { %v493_v55 = vpop.eup %492 }
 0x249   :  { %v292_v56 = vmax.f32 %v493_v55, 0.0001  ;;  %290 = vst.msk [vmem:[#allocation9] sm:$0x3f] %vm289_vm9, %v493_v55 }
 0x24b   :  { %v293_v57 = vmin.f32 %v292_v56, 0.9999 }
 0x24d   :  { %494 = vlog2.f32 %v293_v57  ;;  %v298_v58 = vsub.f32 1.0, %v293_v57 }
 0x24f   :  { %496 = vlog2.f32 %v298_v58 }
 0x25a   :  { %v495_v60 = vpop.eup %494 }
 0x25b   :  { %v295_v62 = vmul.f32 0.6931472, %v495_v60 }
 0x25c   :  { %v497_v63 = vpop.eup %496 }
 0x25d   :  { %v300_v0 = vmul.f32 0.6931472, %v497_v63  ;;  %v296_v1 = vmul.f32 %v295_v62, %v291_v59 }
 0x25f   :  { %v301_v2 = vmul.f32 %v300_v0, %v297_v61 }
 0x261   :  { %v302_v3 = vadd.f32 %v301_v2, %v296_v1 }
 0x263   :  { %v303_v5 = vsub.f32 0.0, %v302_v3 }
 0x265   :  { %v313_v6 = vmul.f32 %v311_v4, %v303_v5 }
 0x267   :  { %v314_v7 = vsel %vm289_vm9, %v313_v6, 0.0 }
 0x268   :  { %315 = vadd.xlane.f32.xlu0 %v314_v7 }
 0x2f1   :  { %v316_v12 = vpop.xlane.xlu0 %315 }
 0x2f2   :  { %v317_v13 = vrot.slane %v316_v12, 4 }
 0x2f4   :  { %v318_v14 = vadd.f32 %v317_v13, %v316_v12 }
 0x2f6   :  { %v319_v16 = vrot.slane %v318_v14, 2 }
 0x2f8   :  { %v320_v17 = vadd.f32 %v319_v16, %v318_v14 }
 0x2f9   :  { %523 = shalt.err (!%p520_p9)
}
 0x2fa   :  { %355 = dma.vmem_to_hbm [thread:$0]  %s353_s22, 128, %s789_s8, [#allocation5]   ;;  %v332_v18 = vrot.slane %v331_v15, 1 }
 0x2fb   :  { %s532_s11 = scalar_lea.vmem %s363_s26, 128  ;;  %p537_p11 = scmp.lt.s32.totalorder %s363_s26, %s363_s26 }
 0x2fc   :  { %p533_p10 = scmp.ne.s32.totalorder %s363_s26, %s532_s11  ;;  %p538_p12 = scmp.lt.s32.totalorder %s532_s11, %s532_s11 }
 0x2fe   :  { %p539_p13 = por %p538_p12, %p537_p11 }
 0x300   :  { %p540_p0 = pnand %p539_p13, %p533_p10 }
 0x302   :  { %543 = shalt.err (!%p540_p0)
}
 0x303   :  { %365 = dma.vmem_to_hbm [thread:$0]  %s363_s26, 128, %s790_s9, [#allocation10]   ;;  %v321_v19 = vrot.slane %v320_v17, 1  ;;  %v333_v21 = vadd.f32 %v332_v18, %v331_v15 }
 0x304   :  { %s577_s15 = smov 1.0   ;;  %s578_s9 = smov [#allocation11]  }
 0x305   :  { %v322_v20 = vadd.f32 %v321_v19, %v320_v17 }
 0x307   :  { %471 = vpush %v322_v20 }
 0x308   :  { %473 = vpush %v333_v21 }
 0x338   :  { %s472_s13 = spop %471 }
 0x339   :  { %s474_s14 = spop %473 }
 0x33a   :  { %s335_s8 = smul.f32 16.0, %s474_s14 }
 0x33c   :  { %s337_s1 = smax.f32 %s577_s15, %s335_s8  ;;  %p336_p1 = scmp.gt.f32.partialorder %s335_s8, 0.0 }
 0x33d   :  { %v338_v22 = vstv %s337_s1 }
 0x33e   :  { %498 = vrcp.f32 %v338_v22 }
 0x34b   :  { %v499_v23 = vpop.eup %498 }
 0x34c   :  { %475 = vpush %v499_v23 }
 0x37d   :  { %s476_s27 = spop %475 }
 0x37e   :  { %s341_s28 = smul.f32 %s476_s27, %s472_s13 }
 0x380   :  { %s793_s28 = smov (!%p336_p1, %s341_s28), 0.0 }
 0x381   :  { %s343_s2 = smul.f32 4.0, %s793_s28 }
 0x383   :  { %345 = sst [smem:[#allocation11]] %s343_s2 }
 0x384   :  { %373 = dma.smem_to_hbm %s578_s9, 16, %s791_s10, [#allocation6]  }
 0x385   :  { %562 = dma.done.wait [#allocation5], 128  }
 0x386   :  { %563 = vsyncadd [#allocation5], 4294967168 }
 0x387   :  { %564 = dma.done.wait [#allocation10], 128  }
 0x388   :  { %565 = vsyncadd [#allocation10], 4294967168 }
 0x389   :  { %566 = dma.done.wait [#allocation6], 16  }
 0x38a   :  { %567 = vsyncadd [#allocation6], 4294967280 }
 0x38b   :  { %383 = sfence }
 0x38c   :  { %384 = vsyncpa [#allocation5], 1 }
 0x38d   :  { %385 = vsyncpa [#allocation10], 1 }
 0x38e   :  { %386 = vsyncpa [#allocation6], 1 }
 0x38f   :  { %387 = vsyncpa [#allocation7], 1 }

</bundles_post_ra>
